<compile_context>
chip_gen: v7x
topology: tpu7x:2x2x1
jax: 0.10.0
libtpu: 0.0.40
codegen_flags: <defaults>
</compile_context>

<pallas_src>
import math

import jax
import jax.numpy as jnp
from jax import lax
from jax.experimental import pallas as pl
from jax.experimental.pallas import tpu as pltpu

EPS = 1e-5  # nn.LayerNorm default


def _round_up(a: int, b: int) -> int:
    return ((a + b - 1) // b) * b


def _sublane(dtype) -> int:
    size = jnp.dtype(dtype).itemsize
    if size >= 4:
        return 8
    if size == 2:
        return 16
    return 32


def _vmem_capacity_bytes() -> int:
    try:
        return int(pltpu.get_tpu_info().vmem_capacity_bytes)
    except Exception:
        return 64 * 1024 * 1024  # conservative fallback (v7x per-TC)


def prenorm_linear_kernel(x_ref, gamma_ref, beta_ref, w_ref, bias_ref,
                          o_ref, xn_ref):
    """Grid = (row_tiles, n_tiles); j (N) is the inner, 'arbitrary' axis.

    x_ref:      (TR, D)   row tile (same block for every j -> no re-DMA)
    gamma/beta: (1, D)    f32 (pre-cast in the wrapper)
    w_ref:      (D, TN)   weight slab in compute dtype (constant block when
                          the whole W is resident -> single HBM load)
    bias_ref:   (1, TN)   f32
    o_ref:      (TR, TN)
    xn_ref:     (TR, D)   VMEM scratch, normalized rows, persists across j
    """
    j = pl.program_id(1)

    # LayerNorm once per row tile; reused across every output-column tile.
    @pl.when(j == 0)
    def _():
        x = x_ref[...].astype(jnp.float32)
        mu = jnp.mean(x, axis=-1, keepdims=True)
        xc = x - mu
        var = jnp.mean(xc * xc, axis=-1, keepdims=True)
        inv = lax.rsqrt(var + EPS)
        xn = xc * inv * gamma_ref[...] + beta_ref[...]
        xn_ref[...] = xn.astype(xn_ref.dtype)

    # fn = Linear: y = LN(x) @ W[:, j-tile] + b[j-tile]
    # Operands stay in the compute dtype (bf16 -> native MXU path); f32 acc.
    y = jnp.dot(xn_ref[...], w_ref[...], preferred_element_type=jnp.float32)
    o_ref[...] = (y + bias_ref[...]).astype(o_ref.dtype)


def prenorm_linear(x, gamma, beta, w, bias, *, allow_bf16_compute=True):
    """PreNorm(dim, Linear(dim, dim_out)) forward.

    x: [..., D]; gamma/beta: [D]; w: [D, D_out] (in, out); bias: [D_out].
    """
    *lead, D = x.shape
    D_out = w.shape[1]
    rows = math.prod(lead) if lead else 1

    # MXU compute dtype.  f32 weights are downcast to bf16 (native MXU path,
    # f32 accumulation); set allow_bf16_compute=False for strict f32 matmul.
    if allow_bf16_compute and jnp.dtype(w.dtype).itemsize >= 4:
        compute_dtype = jnp.bfloat16
    else:
        compute_dtype = w.dtype

    x_bytes = jnp.dtype(x.dtype).itemsize
    c_bytes = jnp.dtype(compute_dtype).itemsize
    o_bytes = x_bytes

    # Sublane granularity from the widest-packing dtype among row-tiled blocks.
    sub = max(_sublane(x.dtype), _sublane(compute_dtype))

    # Lane-dense output: pad D_out (and W / bias columns) to a multiple of 128
    # so stores are unmasked, then slice the padding off at the end.
    D_out_p = _round_up(D_out, 128)

    # ----- VMEM budget & generation-aware tile targets ----------------------
    cap = _vmem_capacity_bytes()
    vmem_limit = min(cap - 8 * 1024 * 1024, int(cap * 0.85))
    budget = int(vmem_limit * 0.9)  # headroom for params / semaphores

    # Row tile above the MXU/HBM crossover:
    #   128 MiB parts (v5e/v6e) -> 768 rows, 64 MiB parts (v7x) -> 384 rows.
    desired_tr = 768 if cap >= 96 * 1024 * 1024 else 384

    rows_sub = _round_up(rows, sub)
    if rows_sub <= desired_tr:
        tr = rows_sub
    else:
        tr = _round_up(desired_tr, sub)
        # Cap the dead-row overhead of the last tile at ~1/8 of the real rows.
        while tr > sub and (_round_up(rows, tr) - rows) > max(rows // 8, sub):
            tr -= sub

    # Output-column tile candidates: multiples of 128 that divide D_out_p.
    m = D_out_p // 128
    tn_candidates = sorted({128 * d for d in range(1, m + 1) if m % d == 0},
                           reverse=True)

    # Keep the whole W resident in VMEM when it fits comfortably (constant
    # block index -> DMA'd from HBM exactly once for the whole kernel).
    w_resident = D * D_out_p * c_bytes <= budget // 4
    if w_resident:
        tn_idx = 0  # tn = D_out_p
    else:
        tn_idx = next(i for i, t in enumerate(tn_candidates) if t <= 512)
    tn = tn_candidates[tn_idx]

    def footprint(tr_, tn_):
        return (2 * tr_ * D * x_bytes            # x block (double buffered)
                + tr_ * D * c_bytes              # xn scratch
                + 2 * D * tn_ * c_bytes          # W block (double buffered)
                + 2 * tr_ * tn_ * o_bytes        # out block (double buffered)
                + 2 * (2 * D + D_out_p) * 4)     # gamma / beta / bias

    # Fit within the VMEM budget: shrink tn first, then tr (last resort).
    while footprint(tr, tn) > budget and tn_idx + 1 < len(tn_candidates):
        tn_idx += 1
        tn = tn_candidates[tn_idx]
    while footprint(tr, tn) > budget and tr > sub:
        tr = max(sub, _round_up(tr // 2, sub))

    # ----- Padding / parameter prep -----------------------------------------
    rows_p = _round_up(rows, tr)
    x2 = x.reshape(rows, D)
    if rows_p != rows:
        x2 = jnp.pad(x2, ((0, rows_p - rows), (0, 0)))

    gamma2 = gamma.reshape(1, D).astype(jnp.float32)
    beta2 = beta.reshape(1, D).astype(jnp.float32)
    w2 = w.astype(compute_dtype)
    bias2 = bias.reshape(1, D_out).astype(jnp.float32)
    if D_out_p != D_out:
        w2 = jnp.pad(w2, ((0, 0), (0, D_out_p - D_out)))
        bias2 = jnp.pad(bias2, ((0, 0), (0, D_out_p - D_out)))

    grid = (rows_p // tr, D_out_p // tn)

    out2 = pl.pallas_call(
        prenorm_linear_kernel,
        out_shape=jax.ShapeDtypeStruct((rows_p, D_out_p), x.dtype),
        grid_spec=pltpu.PrefetchScalarGridSpec(
            num_scalar_prefetch=0,
            grid=grid,
            in_specs=[
                pl.BlockSpec((tr, D), lambda i, j: (i, 0)),      # x row tile
                pl.BlockSpec((1, D), lambda i, j: (0, 0)),       # gamma
                pl.BlockSpec((1, D), lambda i, j: (0, 0)),       # beta
                pl.BlockSpec((D, tn), lambda i, j: (0, j)),      # W slab
                pl.BlockSpec((1, tn), lambda i, j: (0, j)),      # bias slab
            ],
            out_specs=pl.BlockSpec((tr, tn), lambda i, j: (i, j)),
            scratch_shapes=[pltpu.VMEM((tr, D), compute_dtype)],  # LN result
        ),
        compiler_params=pltpu.CompilerParams(
            dimension_semantics=("parallel", "arbitrary"),
            vmem_limit_bytes=int(vmem_limit),
        ),
    )(x2, gamma2, beta2, w2, bias2)

    out2 = out2[:rows, :D_out]
    return out2.reshape(*lead, D_out)


def prenorm_linear_ref(x, gamma, beta, w, bias, compute_dtype=jnp.float32):
    """Pure-JAX reference (optionally mirroring the kernel's matmul dtype)."""
    xf = x.astype(jnp.float32)
    mu = jnp.mean(xf, axis=-1, keepdims=True)
    var = jnp.mean((xf - mu) ** 2, axis=-1, keepdims=True)
    xn = (xf - mu) / jnp.sqrt(var + EPS) * gamma.astype(jnp.float32) \
        + beta.astype(jnp.float32)
    y = jnp.dot(xn.astype(compute_dtype), w.astype(compute_dtype),
                preferred_element_type=jnp.float32)
    y = y + bias.astype(jnp.float32)
    return y.astype(x.dtype)


def _make_inputs(key, B, S, D):
    kx, kw, kb = jax.random.split(key, 3)
    x = jax.random.normal(kx, (B, S, D), dtype=jnp.float32)
    gamma = jnp.ones((D,), dtype=jnp.float32)   # LayerNorm weight (init)
    beta = jnp.zeros((D,), dtype=jnp.float32)   # LayerNorm bias (init)
    w = jax.random.normal(kw, (D, D), dtype=jnp.float32) * (1.0 / math.sqrt(D))
    bias = jax.random.normal(kb, (D,), dtype=jnp.float32) * 0.01
    return x, gamma, beta, w, bias


if __name__ == "__main__":
    key = jax.random.PRNGKey(0)
    k1, k2 = jax.random.split(key, 2)

    # Case 1: lane-dense hidden size (D multiple of 128), bf16 MXU path.
    x, gamma, beta, w, bias = _make_inputs(k1, B=2, S=16, D=128)
    out = prenorm_linear(x, gamma, beta, w, bias)
    jax.block_until_ready(out)
    assert out.shape == x.shape
    ref_bf16 = prenorm_linear_ref(x, gamma, beta, w, bias,
                                  compute_dtype=jnp.bfloat16)
    ref_f32 = prenorm_linear_ref(x, gamma, beta, w, bias)
    assert jnp.allclose(out, ref_bf16, atol=1e-2, rtol=1e-2), "mismatch (bf16 path)"
    assert jnp.allclose(out, ref_f32, atol=5e-2, rtol=5e-2), "mismatch (vs f32 ref)"

    # Case 2: ragged row count (B*S not a multiple of the sublane tile) and a
    # hidden size that is not a multiple of 128 (exercises D_out padding).
    x, gamma, beta, w, bias = _make_inputs(k2, B=3, S=5, D=32)
    out = prenorm_linear(x, gamma, beta, w, bias)
    jax.block_until_ready(out)
    assert out.shape == x.shape
    ref_bf16 = prenorm_linear_ref(x, gamma, beta, w, bias,
                                  compute_dtype=jnp.bfloat16)
    assert jnp.allclose(out, ref_bf16, atol=1e-2, rtol=1e-2), "mismatch (ragged)"

    print("KERNEL_OK")
</pallas_src>

<mosaic_0001>
module attributes {stable_mosaic.version = 11 : i64} {
  func.func @prenorm_linear_kernel(%arg0: i32, %arg1: i32, %arg2: memref<32x128xf32, #tpu.memory_space<vmem>>, %arg3: memref<1x128xf32, #tpu.memory_space<vmem>>, %arg4: memref<1x128xf32, #tpu.memory_space<vmem>>, %arg5: memref<128x128xbf16, #tpu.memory_space<vmem>>, %arg6: memref<1x128xf32, #tpu.memory_space<vmem>>, %arg7: memref<32x128xf32, #tpu.memory_space<vmem>>, %arg8: memref<32x128xbf16, #tpu.memory_space<vmem>>) attributes {dimension_semantics = [#tpu.dimension_semantics<parallel>, #tpu.dimension_semantics<arbitrary>], iteration_bounds = array<i64: 1, 1>, scalar_prefetch = 0 : i64, scratch_operands = 1 : i64, tpu.core_type = #tpu.core_type<tc>, window_params = [{transform_indices = @transform_0, window_bounds = array<i64: 32, 128>}, {pipeline_mode = #tpu.pipeline_mode<synchronous>, transform_indices = @transform_1, window_bounds = array<i64: 1, 128>}, {pipeline_mode = #tpu.pipeline_mode<synchronous>, transform_indices = @transform_2, window_bounds = array<i64: 1, 128>}, {transform_indices = @transform_3, window_bounds = array<i64: 128, 128>}, {transform_indices = @transform_4, window_bounds = array<i64: 1, 128>}, {transform_indices = @transform_5, window_bounds = array<i64: 32, 128>}]} {
    %c0_i32 = arith.constant 0 : i32
    %0 = arith.cmpi eq, %arg1, %c0_i32 : i32
    %1 = arith.extui %0 : i1 to i32
    %c0_i32_0 = arith.constant 0 : i32
    %2 = arith.cmpi ne, %1, %c0_i32_0 : i32
    scf.if %2 {
      %c0_8 = arith.constant 0 : index
      %c0_9 = arith.constant 0 : index
      %10 = vector.load %arg2[%c0_8, %c0_9] : memref<32x128xf32, #tpu.memory_space<vmem>>, vector<32x128xf32>
      %cst_10 = arith.constant dense<0.000000e+00> : vector<32xf32>
      %11 = vector.multi_reduction <add>, %10, %cst_10 [1] : vector<32x128xf32> to vector<32xf32>
      %12 = vector.shape_cast %11 : vector<32xf32> to vector<32x1xf32>
      %cst_11 = arith.constant 1.280000e+02 : f32
      %13 = vector.broadcast %cst_11 : f32 to vector<32x1xf32>
      %14 = arith.divf %12, %13 : vector<32x1xf32>
      %15 = vector.broadcast %14 : vector<32x1xf32> to vector<32x128xf32>
      %16 = arith.subf %10, %15 : vector<32x128xf32>
      %17 = arith.mulf %16, %16 : vector<32x128xf32>
      %cst_12 = arith.constant dense<0.000000e+00> : vector<32xf32>
      %18 = vector.multi_reduction <add>, %17, %cst_12 [1] : vector<32x128xf32> to vector<32xf32>
      %19 = vector.shape_cast %18 : vector<32xf32> to vector<32x1xf32>
      %cst_13 = arith.constant 1.280000e+02 : f32
      %20 = vector.broadcast %cst_13 : f32 to vector<32x1xf32>
      %21 = arith.divf %19, %20 : vector<32x1xf32>
      %cst_14 = arith.constant 9.99999974E-6 : f32
      %22 = vector.broadcast %cst_14 : f32 to vector<32x1xf32>
      %23 = arith.addf %21, %22 : vector<32x1xf32>
      %24 = math.rsqrt %23 : vector<32x1xf32>
      %25 = vector.broadcast %24 : vector<32x1xf32> to vector<32x128xf32>
      %26 = arith.mulf %16, %25 : vector<32x128xf32>
      %c0_15 = arith.constant 0 : index
      %c0_16 = arith.constant 0 : index
      %27 = vector.load %arg3[%c0_15, %c0_16] : memref<1x128xf32, #tpu.memory_space<vmem>>, vector<1x128xf32>
      %28 = vector.broadcast %27 : vector<1x128xf32> to vector<32x128xf32>
      %29 = arith.mulf %26, %28 : vector<32x128xf32>
      %c0_17 = arith.constant 0 : index
      %c0_18 = arith.constant 0 : index
      %30 = vector.load %arg4[%c0_17, %c0_18] : memref<1x128xf32, #tpu.memory_space<vmem>>, vector<1x128xf32>
      %31 = vector.broadcast %30 : vector<1x128xf32> to vector<32x128xf32>
      %32 = arith.addf %29, %31 : vector<32x128xf32>
      %33 = arith.truncf %32 : vector<32x128xf32> to vector<32x128xbf16>
      %c0_19 = arith.constant 0 : index
      %c0_20 = arith.constant 0 : index
      %34 = vector.load %arg8[%c0_19, %c0_20] : memref<32x128xbf16, #tpu.memory_space<vmem>>, vector<32x128xbf16>
      tpu.vector_store %arg8[%c0_19, %c0_20], %33 {strides = array<i32>} : memref<32x128xbf16, #tpu.memory_space<vmem>>, vector<32x128xbf16>,
    } else {
    }
    %c0 = arith.constant 0 : index
    %c0_1 = arith.constant 0 : index
    %3 = vector.load %arg8[%c0, %c0_1] : memref<32x128xbf16, #tpu.memory_space<vmem>>, vector<32x128xbf16>
    %c0_2 = arith.constant 0 : index
    %c0_3 = arith.constant 0 : index
    %4 = vector.load %arg5[%c0_2, %c0_3] : memref<128x128xbf16, #tpu.memory_space<vmem>>, vector<128x128xbf16>
    %cst = arith.constant dense<0.000000e+00> : vector<32x128xf32>
    %5 = tpu.matmul %3, %4, %cst {dimension_numbers = #tpu.dot_dimension_numbers<[1], [0], [0], [1], [0, 0, 1, 1], [], []>} : vector<32x128xbf16>, vector<128x128xbf16>, vector<32x128xf32> -> vector<32x128xf32>
    %c0_4 = arith.constant 0 : index
    %c0_5 = arith.constant 0 : index
    %6 = vector.load %arg6[%c0_4, %c0_5] : memref<1x128xf32, #tpu.memory_space<vmem>>, vector<1x128xf32>
    %7 = vector.broadcast %6 : vector<1x128xf32> to vector<32x128xf32>
    %8 = arith.addf %5, %7 : vector<32x128xf32>
    %c0_6 = arith.constant 0 : index
    %c0_7 = arith.constant 0 : index
    %9 = vector.load %arg7[%c0_6, %c0_7] : memref<32x128xf32, #tpu.memory_space<vmem>>, vector<32x128xf32>
    tpu.vector_store %arg7[%c0_6, %c0_7], %8 {strides = array<i32>} : memref<32x128xf32, #tpu.memory_space<vmem>>, vector<32x128xf32>,
    return
  }
  func.func @transform_0(%arg0: i32, %arg1: i32) -> (i32, i32) {
    %c0_i32 = arith.constant 0 : i32
    %c0_i32_0 = arith.constant 0 : i32
    return %arg0, %c0_i32 : i32, i32
  }
  func.func @transform_1(%arg0: i32, %arg1: i32) -> (i32, i32) {
    %c0_i32 = arith.constant 0 : i32
    %c0_i32_0 = arith.constant 0 : i32
    %c0_i32_1 = arith.constant 0 : i32
    return %c0_i32, %c0_i32_0 : i32, i32
  }
  func.func @transform_2(%arg0: i32, %arg1: i32) -> (i32, i32) {
    %c0_i32 = arith.constant 0 : i32
    %c0_i32_0 = arith.constant 0 : i32
    %c0_i32_1 = arith.constant 0 : i32
    return %c0_i32, %c0_i32_0 : i32, i32
  }
  func.func @transform_3(%arg0: i32, %arg1: i32) -> (i32, i32) {
    %c0_i32 = arith.constant 0 : i32
    %c0_i32_0 = arith.constant 0 : i32
    return %c0_i32, %arg1 : i32, i32
  }
  func.func @transform_4(%arg0: i32, %arg1: i32) -> (i32, i32) {
    %c0_i32 = arith.constant 0 : i32
    %c0_i32_0 = arith.constant 0 : i32
    return %c0_i32, %arg1 : i32, i32
  }
  func.func @transform_5(%arg0: i32, %arg1: i32) -> (i32, i32) {
    %c0_i32 = arith.constant 0 : i32
    return %arg0, %arg1 : i32, i32
  }
}

</mosaic_0001>

<bundles_post_ra>
// kernel: tpu_custom_call.1
= control target key start
LH: loop header
LB: loop body
LE: loop exit
PB: predicated region body
PF: predicated region fallthrough
CT: control target
= control target key end

     0   :  { %10 = vsyncpa [#allocation4], 0  ;;  %s497_s0 = inlined_call_operand.hbm [shape: f32[32,128], index: 0, kind: input, shape index: {}]   ;;  %s498_s1 = inlined_call_operand.vmem [shape: f32[1,128], index: 1, kind: input, shape index: {}]   ;;  %s499_s2 = inlined_call_operand.vmem [shape: f32[1,128], index: 2, kind: input, shape index: {}]   ;;  %s500_s3 = inlined_call_operand.hbm [shape: bf16[128,128], index: 3, kind: input, shape index: {}]   ;;  %s501_s4 = inlined_call_operand.vmem [shape: f32[1,128], index: 4, kind: input, shape index: {}]   ;;  %s502_s5 = inlined_call_operand.hbm [shape: f32[32,128], index: 5, kind: output, shape index: {}]  }
   0x1   :  { %11 = vsyncpa [#allocation7], 0 }
   0x2   :  { %12 = vsyncpa [#allocation5], 0  ;;  %s409_s18 = smov [#allocation3]   ;;  %s337_s22 = scalar_lea.hbm %s497_s0, 512 }
   0x3   :  { %s18_s19 = sshll.u32 %s409_s18, 4  ;;  %p338_p0 = scmp.ne.s32.totalorder %s497_s0, %s337_s22  ;;  %s19_s19 = int_to_ptr.vmem [resolvable:$true] %s18_s19 }
   0x4   :  { %p341_p1 = scmp.lt.u32.totalorder %s337_s22, %s497_s0 }
   0x6   :  { %p343_p2 = pnand %p341_p1, %p338_p0 }
   0x8   :  { %346 = shalt.err (!%p343_p2)
}
   0x9   :  { %s347_s27 = scalar_lea.vmem %s19_s19, 512  ;;  %p352_p4 = scmp.lt.s32.totalorder %s19_s19, %s19_s19 }
   0xa   :  { %p348_p3 = scmp.ne.s32.totalorder %s19_s19, %s347_s27  ;;  %p353_p5 = scmp.lt.s32.totalorder %s347_s27, %s347_s27 }
   0xc   :  { %p354_p6 = por %p353_p5, %p352_p4 }
   0xe   :  { %p355_p7 = pnand %p354_p6, %p348_p3 }
  0x10   :  { %358 = shalt.err (!%p355_p7)
}
  0x11   :  { %s410_s28 = smov 128   ;;  %s411_s29 = smov 8  }
  0x12   :  { %24 = dma.hbm_to_vmem [thread:$0]  %s497_s0, 512, %s19_s19, [#allocation4], %s410_s28, %s410_s28, %s411_s29  }
  0x13   :  { %s412_s7 = smov [#allocation6]   ;;  %s359_s11 = scalar_lea.hbm %s500_s3, 1024 }
  0x14   :  { %s34_s8 = sshll.u32 %s412_s7, 4  ;;  %p360_p8 = scmp.ne.s32.totalorder %s500_s3, %s359_s11  ;;  %s35_s8 = int_to_ptr.vmem [resolvable:$true] %s34_s8 }
  0x15   :  { %p363_p9 = scmp.lt.u32.totalorder %s359_s11, %s500_s3 }
  0x17   :  { %p365_p10 = pnand %p363_p9, %p360_p8 }
  0x19   :  { %368 = shalt.err (!%p365_p10)
}
  0x1a   :  { %s369_s16 = scalar_lea.vmem %s35_s8, 1024  ;;  %p374_p12 = scmp.lt.s32.totalorder %s35_s8, %s35_s8 }
  0x1b   :  { %p370_p11 = scmp.ne.s32.totalorder %s35_s8, %s369_s16  ;;  %p375_p13 = scmp.lt.s32.totalorder %s369_s16, %s369_s16 }
  0x1d   :  { %p376_p0 = por %p375_p13, %p374_p12 }
  0x1f   :  { %p377_p1 = pnand %p376_p0, %p370_p11 }
  0x21   :  { %380 = shalt.err (!%p377_p1)
}
  0x22   :  { %s413_s0 = smov 64   ;;  %s414_s17 = smov 4  }
  0x23   :  { %40 = dma.hbm_to_vmem [thread:$0]  %s500_s3, 1024, %s35_s8, [#allocation7], %s413_s0, %s413_s0, %s414_s17  }
  0x24   :  { %403 = dma.done.wait [#allocation4], 512  }
  0x25   :  { %404 = vsyncadd [#allocation4], 4294966784 }
  0x26   :  { %405 = dma.done.wait [#allocation7], 1024  }
  0x27   :  { %406 = vsyncadd [#allocation7], 4294966272  ;;  %v54_v0 = vld [vmem:[#allocation3] sm:$0xff]  ;;  %v56_v1 = vld [vmem:[#allocation3 + $0x10] sm:$0xff] }
  0x28   :  { %v55_v2 = vld [vmem:[#allocation3 + $0x8] sm:$0xff]  ;;  %58 = vadd.xlane.f32.xlu0 %v54_v0  ;;  %62 = vadd.xlane.f32.xlu1 %v56_v1  ;;  %v57_v3 = vld [vmem:[#allocation3 + $0x18] sm:$0xff]  ;;  %v321_v4 = vld [vmem:[#allocation6] sm:$0xff]  }
  0x29   :  { %294 = vmatprep.subr.bf16.mxu0 %v321_v4  ;;  %v322_v21 = vld [vmem:[#allocation6 + $0x8] sm:$0xff]   ;;  %v323_v22 = vld [vmem:[#allocation6 + $0x10] sm:$0xff]   ;;  %v324_v23 = vld [vmem:[#allocation6 + $0x18] sm:$0xff]  }
  0x2a   :  { %295 = vmatpush3.bf16.msra.mxu0 %v321_v4  ;;  %v325_v24 = vld [vmem:[#allocation6 + $0x20] sm:$0xff]   ;;  %v326_v25 = vld [vmem:[#allocation6 + $0x28] sm:$0xff]   ;;  %v327_v26 = vld [vmem:[#allocation6 + $0x30] sm:$0xff]  }
  0x2b   :  { %296 = vmatprep.subr.bf16.mxu0 %v322_v21  ;;  %v328_v27 = vld [vmem:[#allocation6 + $0x38] sm:$0xff]   ;;  %v273_v42 = vld [vmem:[%s498_s1] ss:$0 sm:$0xff] }
  0x2c   :  { %60 = vadd.xlane.f32.xlu0 %v55_v2  ;;  %64 = vadd.xlane.f32.xlu1 %v57_v3  ;;  %v274_v47 = vld [vmem:[%s499_s2] ss:$0 sm:$0xff]  ;;  %s415_s2 = smov [#allocation8]  }
  0x2d   :  { %v275_v60 = vld [vmem:[%s501_s4] ss:$0 sm:$0xff]  ;;  %s260_s24 = sshll.u32 %s415_s2, 4  ;;  %s261_s24 = int_to_ptr.vmem [resolvable:$true] %s260_s24 }
  0x2e   :  { %297 = vmatpush3.bf16.msra.mxu0 %v322_v21  ;;  %s381_s25 = scalar_lea.vmem %s261_s24, 512  ;;  %p386_p3 = scmp.lt.s32.totalorder %s261_s24, %s261_s24 }
  0x2f   :  { %298 = vmatprep.subr.bf16.mxu0 %v323_v22  ;;  %p382_p2 = scmp.ne.s32.totalorder %s261_s24, %s381_s25  ;;  %p387_p4 = scmp.lt.s32.totalorder %s381_s25, %s381_s25 }
  0x31   :  { %p388_p5 = por %p387_p4, %p386_p3 }
  0x32   :  { %299 = vmatpush3.bf16.msra.mxu0 %v323_v22 }
  0x33   :  { %300 = vmatprep.subr.bf16.mxu0 %v324_v23  ;;  %p389_p6 = pnand %p388_p5, %p382_p2 }
  0x36   :  { %301 = vmatpush3.bf16.msra.mxu0 %v324_v23 }
  0x37   :  { %302 = vmatprep.subr.bf16.mxu0 %v325_v24 }
  0x3a   :  { %303 = vmatpush3.bf16.msra.mxu0 %v325_v24 }
  0x3b   :  { %304 = vmatprep.subr.bf16.mxu0 %v326_v25 }
  0x3e   :  { %305 = vmatpush3.bf16.msra.mxu0 %v326_v25 }
  0x3f   :  { %306 = vmatprep.subr.bf16.mxu0 %v327_v26 }
  0x42   :  { %307 = vmatpush3.bf16.msra.mxu0 %v327_v26 }
  0x43   :  { %308 = vmatprep.subr.bf16.mxu0 %v328_v27 }
  0x46   :  { %309 = vmatpush3.bf16.msra.mxu0 %v328_v27 }
  0xb5   :  { %v59_v5 = vpop.xlane.xlu0 %58  ;;  %v63_v6 = vpop.xlane.xlu1 %62 }
  0xb6   :  { %v67_v7 = vmul.f32 0.0078125, %v59_v5  ;;  %v69_v8 = vmul.f32 0.0078125, %v63_v6 }
  0xb8   :  { %v71_v9 = vsub.f32 %v54_v0, %v67_v7  ;;  %v73_v10 = vsub.f32 %v56_v1, %v69_v8 }
  0xb9   :  { %v61_v11 = vpop.xlane.xlu0 %60  ;;  %v65_v12 = vpop.xlane.xlu1 %64 }
  0xba   :  { %v68_v13 = vmul.f32 0.0078125, %v61_v11  ;;  %v75_v14 = vmul.f32 %v71_v9, %v71_v9  ;;  %v70_v15 = vmul.f32 0.0078125, %v65_v12  ;;  %v77_v18 = vmul.f32 %v73_v10, %v73_v10 }
  0xbc   :  { %v72_v16 = vsub.f32 %v55_v2, %v68_v13  ;;  %79 = vadd.xlane.f32.xlu0 %v75_v14  ;;  %v74_v17 = vsub.f32 %v57_v3, %v70_v15 }
  0xbe   :  { %v76_v19 = vmul.f32 %v72_v16, %v72_v16  ;;  %v78_v20 = vmul.f32 %v74_v17, %v74_v17 }
  0xc0   :  { %83 = vadd.xlane.f32.xlu0 %v77_v18  ;;  %81 = vadd.xlane.f32.xlu1 %v76_v19 }
  0xc4   :  { %85 = vadd.xlane.f32.xlu1 %v78_v20 }
 0x149   :  { %v80_v28 = vpop.xlane.xlu0 %79 }
 0x14a   :  { %v87_v29 = vmul.f32 0.0078125, %v80_v28 }
 0x14c   :  { %v91_v30 = vadd.f32 1e-05, %v87_v29 }
 0x14d   :  { %v82_v31 = vpop.xlane.xlu1 %81  ;;  %v84_v32 = vpop.xlane.xlu0 %83 }
 0x14e   :  { %329 = vrsqrt.f32 %v91_v30  ;;  %v88_v33 = vmul.f32 0.0078125, %v82_v31  ;;  %v89_v34 = vmul.f32 0.0078125, %v84_v32 }
 0x150   :  { %v92_v35 = vadd.f32 1e-05, %v88_v33  ;;  %v93_v36 = vadd.f32 1e-05, %v89_v34 }
 0x151   :  { %v86_v37 = vpop.xlane.xlu1 %85 }
 0x152   :  { %331 = vrsqrt.f32 %v92_v35  ;;  %v90_v38 = vmul.f32 0.0078125, %v86_v37 }
 0x153   :  { %333 = vrsqrt.f32 %v93_v36 }
 0x154   :  { %v94_v39 = vadd.f32 1e-05, %v90_v38 }
 0x156   :  { %335 = vrsqrt.f32 %v94_v39 }
 0x158   :  { %v330_v40 = vpop.eup %329 }
 0x159   :  { %v99_v41 = vmul.f32 %v330_v40, %v71_v9 }
 0x15b   :  { %v110_v46 = vmul.f32 %v273_v42, %v99_v41 }
 0x15c   :  { %v332_v43 = vpop.eup %331 }
 0x15d   :  { %v334_v44 = vpop.eup %333  ;;  %v100_v45 = vmul.f32 %v332_v43, %v72_v16  ;;  %v121_v51 = vadd.f32 %v274_v47, %v110_v46 }
 0x15e   :  { %v101_v48 = vmul.f32 %v334_v44, %v73_v10 }
 0x15f   :  { %v111_v49 = vmul.f32 %v273_v42, %v100_v45 }
 0x160   :  { %v336_v50 = vpop.eup %335  ;;  %v112_v54 = vmul.f32 %v273_v42, %v101_v48 }
 0x161   :  { %v122_v52 = vadd.f32 %v274_v47, %v111_v49  ;;  %v102_v53 = vmul.f32 %v336_v50, %v74_v17 }
 0x162   :  { %v123_v57 = vadd.f32 %v274_v47, %v112_v54 }
 0x163   :  { %v125_v55 = vpack.c.bf16 %v122_v52, %v121_v51  ;;  %v113_v56 = vmul.f32 %v273_v42, %v102_v53 }
 0x165   :  { %310 = vmatprep.mubr.bf16.mxu0 %v125_v55  ;;  %v124_v58 = vadd.f32 %v274_v47, %v113_v56 }
 0x167   :  { %v126_v59 = vpack.c.bf16 %v124_v58, %v123_v57 }
 0x169   :  { %311 = vmatmul.mubr.bf16.vlgmr.msra.gmra.mrb[0].mxu0 %v126_v59 }
 0x23c   :  { %v312_v61 = vpop.f32.mrb[0].mxu0 }
 0x23d   :  { %v245_v62 = vadd.f32 %v312_v61, %v275_v60  ;;  %v236_v63 = vpop.f32.mrb[1].mxu0 }
 0x23e   :  { %v237_v0 = vadd.f32 %v275_v60, %v236_v63  ;;  %v313_v1 = vpop.f32.mrb[2].mxu0 }
 0x23f   :  { %253 = vst [vmem:[#allocation8 + $0x10] sm:$0xff] %v245_v62  ;;  %v248_v2 = vadd.f32 %v313_v1, %v275_v60  ;;  %v239_v3 = vpop.f32.mrb[3].mxu0 }
 0x240   :  { %251 = vst [vmem:[#allocation8] sm:$0xff] %v237_v0  ;;  %v240_v4 = vadd.f32 %v275_v60, %v239_v3 }
 0x241   :  { %254 = vst [vmem:[#allocation8 + $0x18] sm:$0xff] %v248_v2 }
 0x242   :  { %252 = vst [vmem:[#allocation8 + $0x8] sm:$0xff] %v240_v4 }
 0x243   :  { %392 = shalt.err (!%p389_p6)
}
 0x244   :  { %s393_s27 = scalar_lea.hbm %s502_s5, 512 }
 0x245   :  { %p394_p7 = scmp.ne.s32.totalorder %s502_s5, %s393_s27  ;;  %p397_p8 = scmp.lt.u32.totalorder %s393_s27, %s502_s5 }
 0x247   :  { %p399_p9 = pnand %p397_p8, %p394_p7 }
 0x249   :  { %402 = shalt.err (!%p399_p9)
}
 0x24a   :  { %266 = dma.vmem_to_hbm [thread:$0]  %s261_s24, 512, %s502_s5, [#allocation5], %s410_s28, %s410_s28, %s411_s29  }
 0x24b   :  { %407 = dma.done.wait [#allocation5], 512  }
 0x24c   :  { %408 = vsyncadd [#allocation5], 4294966784 }
 0x24d   :  { %270 = vsyncpa [#allocation4], 1 }
 0x24e   :  { %271 = vsyncpa [#allocation7], 1 }
 0x24f   :  { %272 = vsyncpa [#allocation5], 1 }

</bundles_post_ra>
